<compile_context>
chip_gen: v7x
topology: tpu7x:2x2x1
jax: 0.10.0
libtpu: 0.0.40
codegen_flags: <defaults>
</compile_context>

<pallas_src>
import jax
import jax.numpy as jnp
from jax import lax
from jax.experimental import pallas as pl
from jax.experimental.pallas import tpu as pltpu

BN_EPS = 1e-5
LANE = 128


def _round_up(n, m):
    return ((n + m - 1) // m) * m


def make_dqn_kernel(batch):
    """Build the kernel with the true batch size baked in (BN statistics must
    use the real batch count, not a padded one)."""
    inv_n = 1.0 / float(batch)

    def _bn_relu(h, gamma, beta):
        # BatchNorm1d (training mode, biased variance) folded into an affine:
        #   scale = gamma * rsqrt(var + eps),  shift = beta - mean * scale
        # Stats are one pass (sum, sum-of-squares); the heavy (batch, hidden)
        # tile only sees mul + add + max.
        s = jnp.sum(h, axis=0, keepdims=True)
        ss = jnp.sum(h * h, axis=0, keepdims=True)
        mean = s * inv_n
        var = jnp.maximum(ss * inv_n - mean * mean, 0.0)
        scale = gamma * lax.rsqrt(var + BN_EPS)
        shift = beta - mean * scale
        return jnp.maximum(h * scale + shift, 0.0)

    def dqn_kernel(x_ref, w1_ref, w2_ref, w3_ref, w4_ref, bn_ref, b4_ref, out_ref):
        x = x_ref[...].astype(jnp.float32)  # x.float() in the reference

        # Pre-BN biases are omitted: mean subtraction cancels them exactly.
        h1 = jnp.dot(x, w1_ref[...], preferred_element_type=jnp.float32)
        h1 = _bn_relu(h1, bn_ref[0:1, :], bn_ref[1:2, :])

        h2 = jnp.dot(h1, w2_ref[...], preferred_element_type=jnp.float32)
        h2 = _bn_relu(h2, bn_ref[2:3, :], bn_ref[3:4, :])

        h3 = jnp.dot(h2, w3_ref[...], preferred_element_type=jnp.float32)
        h3 = _bn_relu(h3, bn_ref[4:5, :], bn_ref[5:6, :])

        # h3.view(h3.size(0), -1) is a no-op for 2-D activations.
        out_ref[...] = (
            jnp.dot(h3, w4_ref[...], preferred_element_type=jnp.float32) + b4_ref[...]
        )

    return dqn_kernel


def dqn_forward(x, params):
    """params: dict of (in,out)-layout weights, (1,out) biases / bn params.

    b1/b2/b3 (if present) are ignored — they are mathematically cancelled by
    the training-mode BatchNorm that follows each of fc1..fc3.
    """
    batch, input_size = x.shape
    hidden_size = params["w1"].shape[1]
    output_size = params["w4"].shape[1]

    in_p = _round_up(input_size, LANE)
    h_p = _round_up(hidden_size, LANE)
    out_p = _round_up(output_size, LANE)

    def pad2(a, rows, cols):
        return jnp.pad(a, ((0, rows - a.shape[0]), (0, cols - a.shape[1])))

    # Zero-padding is semantics-preserving: padded weight rows/cols are zero,
    # padded gammas are zero, so padded lanes carry zeros end-to-end.
    x_p = pad2(x.astype(jnp.float32), batch, in_p)
    w1 = pad2(params["w1"], in_p, h_p)
    w2 = pad2(params["w2"], h_p, h_p)
    w3 = pad2(params["w3"], h_p, h_p)
    w4 = pad2(params["w4"], h_p, out_p)
    b4 = pad2(params["b4"], 1, out_p)

    # Pack gamma/beta for the three BN layers into a single (8, h_p) slab
    # (exactly one (8,128) tile when hidden <= 128) -> one DMA instead of six.
    bn = jnp.zeros((8, h_p), jnp.float32)
    bn = bn.at[0, :hidden_size].set(params["g1"][0])
    bn = bn.at[1, :hidden_size].set(params["be1"][0])
    bn = bn.at[2, :hidden_size].set(params["g2"][0])
    bn = bn.at[3, :hidden_size].set(params["be2"][0])
    bn = bn.at[4, :hidden_size].set(params["g3"][0])
    bn = bn.at[5, :hidden_size].set(params["be3"][0])

    vmem = pl.BlockSpec(memory_space=pltpu.MemorySpace.VMEM)
    out_padded = pl.pallas_call(
        make_dqn_kernel(batch),
        out_shape=jax.ShapeDtypeStruct((batch, out_p), jnp.float32),
        in_specs=[vmem] * 7,
        out_specs=vmem,
    )(x_p, w1, w2, w3, w4, bn, b4)
    # TODO(synk): if batch ever needs a grid (large replay batches / v7x 64 MiB
    # VMEM), switch to a two-pass BN (sum/sumsq accumulated in VMEM scratch
    # across batch tiles) before normalizing.
    return out_padded[:, :output_size]


def init_params(key, input_size, hidden_size, output_size):
    ks = jax.random.split(key, 8)

    def linear(kw, kb, fan_in, fan_out):
        bound = 1.0 / jnp.sqrt(jnp.float32(fan_in))
        w = jax.random.uniform(kw, (fan_in, fan_out), jnp.float32, -bound, bound)
        b = jax.random.uniform(kb, (1, fan_out), jnp.float32, -bound, bound)
        return w, b

    w1, b1 = linear(ks[0], ks[1], input_size, hidden_size)
    w2, b2 = linear(ks[2], ks[3], hidden_size, hidden_size)
    w3, b3 = linear(ks[4], ks[5], hidden_size, hidden_size)
    w4, b4 = linear(ks[6], ks[7], hidden_size, output_size)

    ones = jnp.ones((1, hidden_size), jnp.float32)
    zeros = jnp.zeros((1, hidden_size), jnp.float32)
    return dict(
        w1=w1, b1=b1, g1=ones, be1=zeros,
        w2=w2, b2=b2, g2=ones, be2=zeros,
        w3=w3, b3=b3, g3=ones, be3=zeros,
        w4=w4, b4=b4,
    )


def reference_forward(x, p):
    """Faithful to the PyTorch module (biases included; BN cancels them)."""

    def bn_relu(h, g, be):
        mean = jnp.mean(h, axis=0, keepdims=True)
        var = jnp.mean((h - mean) ** 2, axis=0, keepdims=True)
        return jnp.maximum((h - mean) / jnp.sqrt(var + BN_EPS) * g + be, 0.0)

    h1 = bn_relu(x @ p["w1"] + p["b1"], p["g1"], p["be1"])
    h2 = bn_relu(h1 @ p["w2"] + p["b2"], p["g2"], p["be2"])
    h3 = bn_relu(h2 @ p["w3"] + p["b3"], p["g3"], p["be3"])
    return h3 @ p["w4"] + p["b4"]


if __name__ == "__main__":
    INPUT_SIZE, HIDDEN_SIZE, OUTPUT_SIZE, BATCH = 16, 32, 4, 8

    key = jax.random.PRNGKey(0)
    k_x, k_p = jax.random.split(key)
    x = jax.random.normal(k_x, (BATCH, INPUT_SIZE), jnp.float32)
    params = init_params(k_p, INPUT_SIZE, HIDDEN_SIZE, OUTPUT_SIZE)

    out = dqn_forward(x, params)
    out = jax.block_until_ready(out)

    ref = reference_forward(x, params)
    assert out.shape == (BATCH, OUTPUT_SIZE)
    assert jnp.allclose(out, ref, atol=1e-4, rtol=1e-4)

    print("KERNEL_OK")
</pallas_src>

<mosaic_0001>
module attributes {stable_mosaic.version = 11 : i64} {
  func.func @dqn_kernel(%arg0: memref<8x128xf32, #tpu.memory_space<vmem>>, %arg1: memref<128x128xf32, #tpu.memory_space<vmem>>, %arg2: memref<128x128xf32, #tpu.memory_space<vmem>>, %arg3: memref<128x128xf32, #tpu.memory_space<vmem>>, %arg4: memref<128x128xf32, #tpu.memory_space<vmem>>, %arg5: memref<8x128xf32, #tpu.memory_space<vmem>>, %arg6: memref<1x128xf32, #tpu.memory_space<vmem>>, %arg7: memref<8x128xf32, #tpu.memory_space<vmem>>) attributes {dimension_semantics = [], scalar_prefetch = 0 : i64, scratch_operands = 0 : i64, tpu.core_type = #tpu.core_type<tc>} {
    %c0 = arith.constant 0 : index
    %c0_0 = arith.constant 0 : index
    %0 = vector.load %arg0[%c0, %c0_0] : memref<8x128xf32, #tpu.memory_space<vmem>>, vector<8x128xf32>
    %c0_1 = arith.constant 0 : index
    %c0_2 = arith.constant 0 : index
    %1 = vector.load %arg1[%c0_1, %c0_2] : memref<128x128xf32, #tpu.memory_space<vmem>>, vector<128x128xf32>
    %cst = arith.constant dense<0.000000e+00> : vector<8x128xf32>
    %2 = tpu.matmul %0, %1, %cst {dimension_numbers = #tpu.dot_dimension_numbers<[1], [0], [0], [1], [0, 0, 1, 1], [], []>} : vector<8x128xf32>, vector<128x128xf32>, vector<8x128xf32> -> vector<8x128xf32>
    %c0_3 = arith.constant 0 : index
    %c0_4 = arith.constant 0 : index
    %3 = vector.load %arg5[%c0_3, %c0_4] : memref<8x128xf32, #tpu.memory_space<vmem>>, vector<1x128xf32>
    %c1 = arith.constant 1 : index
    %c0_5 = arith.constant 0 : index
    %4 = vector.load %arg5[%c1, %c0_5] : memref<8x128xf32, #tpu.memory_space<vmem>>, vector<1x128xf32>
    %cst_6 = arith.constant dense<0.000000e+00> : vector<128xf32>
    %5 = vector.multi_reduction <add>, %2, %cst_6 [0] : vector<8x128xf32> to vector<128xf32>
    %6 = vector.shape_cast %5 : vector<128xf32> to vector<1x128xf32>
    %7 = arith.mulf %2, %2 : vector<8x128xf32>
    %cst_7 = arith.constant dense<0.000000e+00> : vector<128xf32>
    %8 = vector.multi_reduction <add>, %7, %cst_7 [0] : vector<8x128xf32> to vector<128xf32>
    %9 = vector.shape_cast %8 : vector<128xf32> to vector<1x128xf32>
    %cst_8 = arith.constant 1.250000e-01 : f32
    %10 = vector.broadcast %cst_8 : f32 to vector<1x128xf32>
    %11 = arith.mulf %6, %10 : vector<1x128xf32>
    %cst_9 = arith.constant 1.250000e-01 : f32
    %12 = vector.broadcast %cst_9 : f32 to vector<1x128xf32>
    %13 = arith.mulf %9, %12 : vector<1x128xf32>
    %14 = arith.mulf %11, %11 : vector<1x128xf32>
    %15 = arith.subf %13, %14 : vector<1x128xf32>
    %cst_10 = arith.constant 0.000000e+00 : f32
    %16 = vector.broadcast %cst_10 : f32 to vector<1x128xf32>
    %17 = arith.maximumf %15, %16 : vector<1x128xf32>
    %cst_11 = arith.constant 9.99999974E-6 : f32
    %18 = vector.broadcast %cst_11 : f32 to vector<1x128xf32>
    %19 = arith.addf %17, %18 : vector<1x128xf32>
    %20 = math.rsqrt %19 : vector<1x128xf32>
    %21 = arith.mulf %3, %20 : vector<1x128xf32>
    %22 = arith.mulf %11, %21 : vector<1x128xf32>
    %23 = arith.subf %4, %22 : vector<1x128xf32>
    %24 = vector.broadcast %21 : vector<1x128xf32> to vector<8x128xf32>
    %25 = arith.mulf %2, %24 : vector<8x128xf32>
    %26 = vector.broadcast %23 : vector<1x128xf32> to vector<8x128xf32>
    %27 = arith.addf %25, %26 : vector<8x128xf32>
    %cst_12 = arith.constant 0.000000e+00 : f32
    %28 = vector.broadcast %cst_12 : f32 to vector<8x128xf32>
    %29 = arith.maximumf %27, %28 : vector<8x128xf32>
    %c0_13 = arith.constant 0 : index
    %c0_14 = arith.constant 0 : index
    %30 = vector.load %arg2[%c0_13, %c0_14] : memref<128x128xf32, #tpu.memory_space<vmem>>, vector<128x128xf32>
    %cst_15 = arith.constant dense<0.000000e+00> : vector<8x128xf32>
    %31 = tpu.matmul %29, %30, %cst_15 {dimension_numbers = #tpu.dot_dimension_numbers<[1], [0], [0], [1], [0, 0, 1, 1], [], []>} : vector<8x128xf32>, vector<128x128xf32>, vector<8x128xf32> -> vector<8x128xf32>
    %c2 = arith.constant 2 : index
    %c0_16 = arith.constant 0 : index
    %32 = vector.load %arg5[%c2, %c0_16] : memref<8x128xf32, #tpu.memory_space<vmem>>, vector<1x128xf32>
    %c3 = arith.constant 3 : index
    %c0_17 = arith.constant 0 : index
    %33 = vector.load %arg5[%c3, %c0_17] : memref<8x128xf32, #tpu.memory_space<vmem>>, vector<1x128xf32>
    %cst_18 = arith.constant dense<0.000000e+00> : vector<128xf32>
    %34 = vector.multi_reduction <add>, %31, %cst_18 [0] : vector<8x128xf32> to vector<128xf32>
    %35 = vector.shape_cast %34 : vector<128xf32> to vector<1x128xf32>
    %36 = arith.mulf %31, %31 : vector<8x128xf32>
    %cst_19 = arith.constant dense<0.000000e+00> : vector<128xf32>
    %37 = vector.multi_reduction <add>, %36, %cst_19 [0] : vector<8x128xf32> to vector<128xf32>
    %38 = vector.shape_cast %37 : vector<128xf32> to vector<1x128xf32>
    %cst_20 = arith.constant 1.250000e-01 : f32
    %39 = vector.broadcast %cst_20 : f32 to vector<1x128xf32>
    %40 = arith.mulf %35, %39 : vector<1x128xf32>
    %cst_21 = arith.constant 1.250000e-01 : f32
    %41 = vector.broadcast %cst_21 : f32 to vector<1x128xf32>
    %42 = arith.mulf %38, %41 : vector<1x128xf32>
    %43 = arith.mulf %40, %40 : vector<1x128xf32>
    %44 = arith.subf %42, %43 : vector<1x128xf32>
    %cst_22 = arith.constant 0.000000e+00 : f32
    %45 = vector.broadcast %cst_22 : f32 to vector<1x128xf32>
    %46 = arith.maximumf %44, %45 : vector<1x128xf32>
    %cst_23 = arith.constant 9.99999974E-6 : f32
    %47 = vector.broadcast %cst_23 : f32 to vector<1x128xf32>
    %48 = arith.addf %46, %47 : vector<1x128xf32>
    %49 = math.rsqrt %48 : vector<1x128xf32>
    %50 = arith.mulf %32, %49 : vector<1x128xf32>
    %51 = arith.mulf %40, %50 : vector<1x128xf32>
    %52 = arith.subf %33, %51 : vector<1x128xf32>
    %53 = vector.broadcast %50 : vector<1x128xf32> to vector<8x128xf32>
    %54 = arith.mulf %31, %53 : vector<8x128xf32>
    %55 = vector.broadcast %52 : vector<1x128xf32> to vector<8x128xf32>
    %56 = arith.addf %54, %55 : vector<8x128xf32>
    %cst_24 = arith.constant 0.000000e+00 : f32
    %57 = vector.broadcast %cst_24 : f32 to vector<8x128xf32>
    %58 = arith.maximumf %56, %57 : vector<8x128xf32>
    %c0_25 = arith.constant 0 : index
    %c0_26 = arith.constant 0 : index
    %59 = vector.load %arg3[%c0_25, %c0_26] : memref<128x128xf32, #tpu.memory_space<vmem>>, vector<128x128xf32>
    %cst_27 = arith.constant dense<0.000000e+00> : vector<8x128xf32>
    %60 = tpu.matmul %58, %59, %cst_27 {dimension_numbers = #tpu.dot_dimension_numbers<[1], [0], [0], [1], [0, 0, 1, 1], [], []>} : vector<8x128xf32>, vector<128x128xf32>, vector<8x128xf32> -> vector<8x128xf32>
    %c4 = arith.constant 4 : index
    %c0_28 = arith.constant 0 : index
    %61 = vector.load %arg5[%c4, %c0_28] : memref<8x128xf32, #tpu.memory_space<vmem>>, vector<1x128xf32>
    %c5 = arith.constant 5 : index
    %c0_29 = arith.constant 0 : index
    %62 = vector.load %arg5[%c5, %c0_29] : memref<8x128xf32, #tpu.memory_space<vmem>>, vector<1x128xf32>
    %cst_30 = arith.constant dense<0.000000e+00> : vector<128xf32>
    %63 = vector.multi_reduction <add>, %60, %cst_30 [0] : vector<8x128xf32> to vector<128xf32>
    %64 = vector.shape_cast %63 : vector<128xf32> to vector<1x128xf32>
    %65 = arith.mulf %60, %60 : vector<8x128xf32>
    %cst_31 = arith.constant dense<0.000000e+00> : vector<128xf32>
    %66 = vector.multi_reduction <add>, %65, %cst_31 [0] : vector<8x128xf32> to vector<128xf32>
    %67 = vector.shape_cast %66 : vector<128xf32> to vector<1x128xf32>
    %cst_32 = arith.constant 1.250000e-01 : f32
    %68 = vector.broadcast %cst_32 : f32 to vector<1x128xf32>
    %69 = arith.mulf %64, %68 : vector<1x128xf32>
    %cst_33 = arith.constant 1.250000e-01 : f32
    %70 = vector.broadcast %cst_33 : f32 to vector<1x128xf32>
    %71 = arith.mulf %67, %70 : vector<1x128xf32>
    %72 = arith.mulf %69, %69 : vector<1x128xf32>
    %73 = arith.subf %71, %72 : vector<1x128xf32>
    %cst_34 = arith.constant 0.000000e+00 : f32
    %74 = vector.broadcast %cst_34 : f32 to vector<1x128xf32>
    %75 = arith.maximumf %73, %74 : vector<1x128xf32>
    %cst_35 = arith.constant 9.99999974E-6 : f32
    %76 = vector.broadcast %cst_35 : f32 to vector<1x128xf32>
    %77 = arith.addf %75, %76 : vector<1x128xf32>
    %78 = math.rsqrt %77 : vector<1x128xf32>
    %79 = arith.mulf %61, %78 : vector<1x128xf32>
    %80 = arith.mulf %69, %79 : vector<1x128xf32>
    %81 = arith.subf %62, %80 : vector<1x128xf32>
    %82 = vector.broadcast %79 : vector<1x128xf32> to vector<8x128xf32>
    %83 = arith.mulf %60, %82 : vector<8x128xf32>
    %84 = vector.broadcast %81 : vector<1x128xf32> to vector<8x128xf32>
    %85 = arith.addf %83, %84 : vector<8x128xf32>
    %cst_36 = arith.constant 0.000000e+00 : f32
    %86 = vector.broadcast %cst_36 : f32 to vector<8x128xf32>
    %87 = arith.maximumf %85, %86 : vector<8x128xf32>
    %c0_37 = arith.constant 0 : index
    %c0_38 = arith.constant 0 : index
    %88 = vector.load %arg4[%c0_37, %c0_38] : memref<128x128xf32, #tpu.memory_space<vmem>>, vector<128x128xf32>
    %cst_39 = arith.constant dense<0.000000e+00> : vector<8x128xf32>
    %89 = tpu.matmul %87, %88, %cst_39 {dimension_numbers = #tpu.dot_dimension_numbers<[1], [0], [0], [1], [0, 0, 1, 1], [], []>} : vector<8x128xf32>, vector<128x128xf32>, vector<8x128xf32> -> vector<8x128xf32>
    %c0_40 = arith.constant 0 : index
    %c0_41 = arith.constant 0 : index
    %90 = vector.load %arg6[%c0_40, %c0_41] : memref<1x128xf32, #tpu.memory_space<vmem>>, vector<1x128xf32>
    %91 = vector.broadcast %90 : vector<1x128xf32> to vector<8x128xf32>
    %92 = arith.addf %89, %91 : vector<8x128xf32>
    %c0_42 = arith.constant 0 : index
    %c0_43 = arith.constant 0 : index
    %93 = vector.load %arg7[%c0_42, %c0_43] : memref<8x128xf32, #tpu.memory_space<vmem>>, vector<8x128xf32>
    tpu.vector_store %arg7[%c0_42, %c0_43], %92 {strides = array<i32>} : memref<8x128xf32, #tpu.memory_space<vmem>>, vector<8x128xf32>,
    return
  }
}

</mosaic_0001>

<bundles_post_ra>
// kernel: tpu_custom_call.1
= control target key start
LH: loop header
LB: loop body
LE: loop exit
PB: predicated region body
PF: predicated region fallthrough
CT: control target
= control target key end

     0   :  { %12 = vsyncpa [#allocation3], 0  ;;  %s1237_s0 = inlined_call_operand.hbm [shape: f32[8,128], index: 0, kind: input, shape index: {}]   ;;  %s1238_s1 = inlined_call_operand.hbm [shape: f32[128,128], index: 1, kind: input, shape index: {}]   ;;  %s1239_s2 = inlined_call_operand.hbm [shape: f32[128,128], index: 2, kind: input, shape index: {}]   ;;  %s1240_s3 = inlined_call_operand.hbm [shape: f32[128,128], index: 3, kind: input, shape index: {}]   ;;  %s1241_s4 = inlined_call_operand.hbm [shape: f32[128,128], index: 4, kind: input, shape index: {}]   ;;  %s1242_s5 = inlined_call_operand.vmem [shape: f32[8,128], index: 5, kind: input, shape index: {}]   ;;  %s1243_s6 = inlined_call_operand.vmem [shape: f32[1,128], index: 6, kind: input, shape index: {}]   ;;  %s1244_s7 = inlined_call_operand.hbm [shape: f32[8,128], index: 7, kind: output, shape index: {}]  }
   0x1   :  { %13 = vsyncpa [#allocation6], 0 }
   0x2   :  { %14 = vsyncpa [#allocation9], 0 }
   0x3   :  { %15 = vsyncpa [#allocation4], 0  ;;  %s1033_s24 = smov [#allocation5]   ;;  %s893_s28 = scalar_lea.hbm %s1238_s1, 2048 }
   0x4   :  { %s31_s25 = sshll.u32 %s1033_s24, 4  ;;  %p894_p0 = scmp.ne.s32.totalorder %s1238_s1, %s893_s28  ;;  %s32_s25 = int_to_ptr.vmem [resolvable:$true] %s31_s25 }
   0x5   :  { %p897_p1 = scmp.lt.u32.totalorder %s893_s28, %s1238_s1 }
   0x7   :  { %p899_p2 = pnand %p897_p1, %p894_p0 }
   0x9   :  { %902 = shalt.err (!%p899_p2)
}
   0xa   :  { %s903_s10 = scalar_lea.vmem %s32_s25, 2048  ;;  %p908_p4 = scmp.lt.s32.totalorder %s32_s25, %s32_s25 }
   0xb   :  { %p904_p3 = scmp.ne.s32.totalorder %s32_s25, %s903_s10  ;;  %p909_p5 = scmp.lt.s32.totalorder %s903_s10, %s903_s10 }
   0xd   :  { %p910_p6 = por %p909_p5, %p908_p4 }
   0xf   :  { %p911_p7 = pnand %p910_p6, %p904_p3 }
  0x11   :  { %914 = shalt.err (!%p911_p7)
}
  0x12   :  { %s1034_s11 = smov 128   ;;  %s1035_s12 = smov 8  }
  0x13   :  { %37 = dma.hbm_to_vmem [thread:$0]  %s1238_s1, 2048, %s32_s25, [#allocation6], %s1034_s11, %s1034_s11, %s1035_s12  }
  0x14   :  { %s1036_s15 = smov [#allocation8]   ;;  %s1037_s17 = smov [#allocation2]  }
  0x15   :  { %s55_s16 = sshll.u32 %s1036_s15, 4  ;;  %s22_s18 = sshll.u32 %s1037_s17, 4  ;;  %s56_s16 = int_to_ptr.vmem [resolvable:$true] %s55_s16  ;;  %s23_s18 = int_to_ptr.vmem [resolvable:$true] %s22_s18 }
  0x16   :  { %s915_s21 = scalar_lea.hbm %s1240_s3, 2048 }
  0x17   :  { %p916_p8 = scmp.ne.s32.totalorder %s1240_s3, %s915_s21  ;;  %p919_p9 = scmp.lt.u32.totalorder %s915_s21, %s1240_s3 }
  0x19   :  { %p921_p10 = pnand %p919_p9, %p916_p8 }
  0x1b   :  { %924 = shalt.err (!%p921_p10)
}
  0x1c   :  { %s925_s1 = scalar_lea.vmem %s56_s16, 2048  ;;  %p930_p12 = scmp.lt.s32.totalorder %s56_s16, %s56_s16 }
  0x1d   :  { %p926_p11 = scmp.ne.s32.totalorder %s56_s16, %s925_s1  ;;  %p931_p13 = scmp.lt.s32.totalorder %s925_s1, %s925_s1 }
  0x1f   :  { %p932_p0 = por %p931_p13, %p930_p12 }
  0x21   :  { %p933_p1 = pnand %p932_p0, %p926_p11 }
  0x23   :  { %936 = shalt.err (!%p933_p1)
}
  0x24   :  { %61 = dma.hbm_to_vmem [thread:$0]  %s1240_s3, 2048, %s56_s16, [#allocation9], %s1034_s11, %s1034_s11, %s1035_s12  }
  0x25   :  { %s937_s30 = scalar_lea.hbm %s1237_s0, 128 }
  0x26   :  { %p938_p2 = scmp.ne.s32.totalorder %s1237_s0, %s937_s30  ;;  %p941_p3 = scmp.lt.u32.totalorder %s937_s30, %s1237_s0 }
  0x28   :  { %p943_p4 = pnand %p941_p3, %p938_p2 }
  0x2a   :  { %946 = shalt.err (!%p943_p4)
}
  0x2b   :  { %s947_s14 = scalar_lea.vmem %s23_s18, 128  ;;  %p952_p6 = scmp.lt.s32.totalorder %s23_s18, %s23_s18 }
  0x2c   :  { %p948_p5 = scmp.ne.s32.totalorder %s23_s18, %s947_s14  ;;  %p953_p7 = scmp.lt.s32.totalorder %s947_s14, %s947_s14 }
  0x2e   :  { %p954_p8 = por %p953_p7, %p952_p6 }
  0x30   :  { %p955_p9 = pnand %p954_p8, %p948_p5 }
  0x32   :  { %958 = shalt.err (!%p955_p9)
}
  0x33   :  { %25 = dma.hbm_to_vmem [thread:$0]  %s1237_s0, 128, %s23_s18, [#allocation3]  }
  0x34   :  { %s1038_s16 = smov [#allocation7]   ;;  %s1039_s19 = smov [#allocation10]  }
  0x35   :  { %s43_s17 = sshll.u32 %s1038_s16, 4  ;;  %s67_s20 = sshll.u32 %s1039_s19, 4  ;;  %s44_s17 = int_to_ptr.vmem [resolvable:$true] %s43_s17  ;;  %s68_s20 = int_to_ptr.vmem [resolvable:$true] %s67_s20 }
  0x36   :  { %s959_s23 = scalar_lea.hbm %s1239_s2, 2048 }
  0x37   :  { %p960_p10 = scmp.ne.s32.totalorder %s1239_s2, %s959_s23  ;;  %p963_p11 = scmp.lt.u32.totalorder %s959_s23, %s1239_s2 }
  0x39   :  { %p965_p12 = pnand %p963_p11, %p960_p10 }
  0x3b   :  { %968 = shalt.err (!%p965_p12)
}
  0x3c   :  { %s969_s0 = scalar_lea.vmem %s44_s17, 2048  ;;  %p974_p0 = scmp.lt.s32.totalorder %s44_s17, %s44_s17 }
  0x3d   :  { %p970_p13 = scmp.ne.s32.totalorder %s44_s17, %s969_s0  ;;  %p975_p1 = scmp.lt.s32.totalorder %s969_s0, %s969_s0 }
  0x3f   :  { %p976_p2 = por %p975_p1, %p974_p0 }
  0x41   :  { %p977_p3 = pnand %p976_p2, %p970_p13 }
  0x43   :  { %980 = shalt.err (!%p977_p3)
}
  0x44   :  { %49 = dma.hbm_to_vmem [thread:$0]  %s1239_s2, 2048, %s44_s17, [#allocation6], %s1034_s11, %s1034_s11, %s1035_s12  }
  0x45   :  { %s981_s30 = scalar_lea.hbm %s1241_s4, 2048 }
  0x46   :  { %p982_p4 = scmp.ne.s32.totalorder %s1241_s4, %s981_s30  ;;  %p985_p5 = scmp.lt.u32.totalorder %s981_s30, %s1241_s4 }
  0x48   :  { %p987_p6 = pnand %p985_p5, %p982_p4 }
  0x4a   :  { %990 = shalt.err (!%p987_p6)
}
  0x4b   :  { %s991_s14 = scalar_lea.vmem %s68_s20, 2048  ;;  %p996_p8 = scmp.lt.s32.totalorder %s68_s20, %s68_s20 }
  0x4c   :  { %p992_p7 = scmp.ne.s32.totalorder %s68_s20, %s991_s14  ;;  %p997_p9 = scmp.lt.s32.totalorder %s991_s14, %s991_s14 }
  0x4e   :  { %p998_p10 = por %p997_p9, %p996_p8 }
  0x50   :  { %p999_p11 = pnand %p998_p10, %p992_p7 }
  0x52   :  { %1002 = shalt.err (!%p999_p11)
}
  0x53   :  { %73 = dma.hbm_to_vmem [thread:$0]  %s1241_s4, 2048, %s68_s20, [#allocation9], %s1034_s11, %s1034_s11, %s1035_s12  }
  0x54   :  { %1025 = dma.done.wait [#allocation3], 128  }
  0x55   :  { %1026 = vsyncadd [#allocation3], 4294967168 }
  0x56   :  { %1027 = dma.done.wait [#allocation6], 4096  }
  0x57   :  { %1028 = vsyncadd [#allocation6], 4294963200 }
  0x58   :  { %1029 = dma.done.wait [#allocation9], 4096  }
  0x59   :  { %1030 = vsyncadd [#allocation9], 4294963200  ;;  %v1040_v0 = vmov 0.0|0.0   ;;  %vm1041_vm0 = vmmov 0   ;;  %v1042_v1 = vmov 0.0   ;;  %v94_v2 = vld [vmem:[#allocation5] sm:$0xff] }
  0x5a   :  { %780 = vmatprep.subr.bf16.mxu0 %v1040_v0  ;;  %672 = vmatprep.mubr.msk.f32.mxu0 %vm1041_vm0, %v1042_v1  ;;  %v95_v3 = vld [vmem:[#allocation5 + $0x8] sm:$0xff]  ;;  %v96_v4 = vld [vmem:[#allocation5 + $0x10] sm:$0xff]  ;;  %v97_v6 = vld [vmem:[#allocation5 + $0x18] sm:$0xff]  ;;  %s1043_s25 = smov [#allocation11]  }
  0x5b   :  { %804 = vmatprep.subr.bf16.mxu1 %v1040_v0  ;;  %707 = vmatprep.mubr.msk.f32.mxu1 %vm1041_vm0, %v1042_v1  ;;  %v781_v5 = vpack.c.bf16 %v95_v3, %v94_v2  ;;  %v784_v7 = vpack.c.bf16 %v97_v6, %v96_v4  ;;  %v98_v8 = vld [vmem:[#allocation5 + $0x20] sm:$0xff]  ;;  %v99_v9 = vld [vmem:[#allocation5 + $0x28] sm:$0xff]  ;;  %v100_v11 = vld [vmem:[#allocation5 + $0x30] sm:$0xff]  ;;  %s560_s0 = sshll.u32 %s1043_s25, 4  ;;  %s561_s0 = int_to_ptr.vmem [resolvable:$true] %s560_s0 }
  0x5c   :  { %v787_v10 = vpack.c.bf16 %v99_v9, %v98_v8  ;;  %v101_v12 = vld [vmem:[#allocation5 + $0x38] sm:$0xff]  ;;  %v102_v14 = vld [vmem:[#allocation5 + $0x40] sm:$0xff]  ;;  %v103_v15 = vld [vmem:[#allocation5 + $0x48] sm:$0xff]  ;;  %p1008_p13 = scmp.lt.s32.totalorder %s561_s0, %s561_s0 }
  0x5d   :  { %782 = vmatpush3.bf16.msra.mxu0 %v781_v5  ;;  %v790_v13 = vpack.c.bf16 %v101_v12, %v100_v11  ;;  %v793_v16 = vpack.c.bf16 %v103_v15, %v102_v14  ;;  %v104_v17 = vld [vmem:[#allocation5 + $0x50] sm:$0xff]  ;;  %v105_v18 = vld [vmem:[#allocation5 + $0x58] sm:$0xff]  ;;  %v106_v20 = vld [vmem:[#allocation5 + $0x60] sm:$0xff] }
  0x5e   :  { %783 = vmatprep.subr.bf16.mxu0 %v1040_v0  ;;  %v796_v19 = vpack.c.bf16 %v105_v18, %v104_v17  ;;  %v107_v21 = vld [vmem:[#allocation5 + $0x68] sm:$0xff]  ;;  %v108_v23 = vld [vmem:[#allocation5 + $0x70] sm:$0xff]  ;;  %v109_v24 = vld [vmem:[#allocation5 + $0x78] sm:$0xff] }
  0x5f   :  { %v799_v22 = vpack.c.bf16 %v107_v21, %v106_v20  ;;  %v802_v25 = vpack.c.bf16 %v109_v24, %v108_v23  ;;  %v93_v26 = vld [vmem:[#allocation2] sm:$0xff]  ;;  %v216_v27 = vld [vmem:[#allocation7] sm:$0xff]  ;;  %v217_v28 = vld [vmem:[#allocation7 + $0x8] sm:$0xff] }
  0x60   :  { %v805_v29 = vpack.c.bf16 %v217_v28, %v216_v27  ;;  %v218_v30 = vld [vmem:[#allocation7 + $0x10] sm:$0xff]  ;;  %v219_v31 = vld [vmem:[#allocation7 + $0x18] sm:$0xff]  ;;  %v220_v33 = vld [vmem:[#allocation7 + $0x20] sm:$0xff] }
  0x61   :  { %785 = vmatpush3.bf16.msra.mxu0 %v784_v7  ;;  %v808_v32 = vpack.c.bf16 %v219_v31, %v218_v30  ;;  %v221_v34 = vld [vmem:[#allocation7 + $0x28] sm:$0xff]  ;;  %v222_v36 = vld [vmem:[#allocation7 + $0x30] sm:$0xff]  ;;  %v223_v37 = vld [vmem:[#allocation7 + $0x38] sm:$0xff] }
  0x62   :  { %786 = vmatprep.subr.bf16.mxu0 %v1040_v0  ;;  %806 = vmatpush3.bf16.msra.mxu1 %v805_v29  ;;  %v811_v35 = vpack.c.bf16 %v221_v34, %v220_v33  ;;  %v814_v38 = vpack.c.bf16 %v223_v37, %v222_v36  ;;  %v224_v39 = vld [vmem:[#allocation7 + $0x40] sm:$0xff]  ;;  %v225_v40 = vld [vmem:[#allocation7 + $0x48] sm:$0xff]  ;;  %v226_v42 = vld [vmem:[#allocation7 + $0x50] sm:$0xff] }
  0x63   :  { %807 = vmatprep.subr.bf16.mxu1 %v1040_v0  ;;  %v817_v41 = vpack.c.bf16 %v225_v40, %v224_v39  ;;  %v227_v43 = vld [vmem:[#allocation7 + $0x58] sm:$0xff]  ;;  %v228_v45 = vld [vmem:[#allocation7 + $0x60] sm:$0xff]  ;;  %v229_v46 = vld [vmem:[#allocation7 + $0x68] sm:$0xff] }
  0x64   :  { %v820_v44 = vpack.c.bf16 %v227_v43, %v226_v42  ;;  %v823_v47 = vpack.c.bf16 %v229_v46, %v228_v45  ;;  %v230_v48 = vld [vmem:[#allocation7 + $0x70] sm:$0xff]  ;;  %v231_v49 = vld [vmem:[#allocation7 + $0x78] sm:$0xff]  ;;  %v338_v24 = vld [vmem:[#allocation8] sm:$0xff] }
  0x65   :  { %788 = vmatpush3.bf16.msra.mxu0 %v787_v10  ;;  %v826_v50 = vpack.c.bf16 %v231_v49, %v230_v48  ;;  %v205_v10 = vlaneseq  ;;  %v180_v12 = vld [vmem:[%s1242_s5] sm:$0x1]  ;;  %v340_v27 = vld [vmem:[#allocation8 + $0x10] sm:$0xff]  ;;  %v342_v30 = vld [vmem:[#allocation8 + $0x20] sm:$0xff] }
  0x66   :  { %789 = vmatprep.subr.bf16.mxu0 %v1040_v0  ;;  %809 = vmatpush3.bf16.msra.mxu1 %v808_v32  ;;  %v341_v28 = vld [vmem:[#allocation8 + $0x18] sm:$0xff]  ;;  %v343_v31 = vld [vmem:[#allocation8 + $0x28] sm:$0xff]  ;;  %v344_v33 = vld [vmem:[#allocation8 + $0x30] sm:$0xff] }
  0x67   :  { %810 = vmatprep.subr.bf16.mxu1 %v1040_v0  ;;  %v206_v11 = vshrl.u32 %v205_v10, 7  ;;  %v832_v29 = vpack.c.bf16 %v341_v28, %v340_v27  ;;  %v835_v32 = vpack.c.bf16 %v343_v31, %v342_v30  ;;  %v347_v36 = vld [vmem:[#allocation8 + $0x48] sm:$0xff]  ;;  %v349_v39 = vld [vmem:[#allocation8 + $0x58] sm:$0xff]  ;;  %v466_v27 = vld [vmem:[#allocation10 + $0x30] sm:$0xff] }
  0x68   :  { %v351_v42 = vld [vmem:[#allocation8 + $0x68] sm:$0xff]  ;;  %v353_v45 = vld [vmem:[#allocation8 + $0x78] sm:$0xff]  ;;  %v468_v30 = vld [vmem:[#allocation10 + $0x40] sm:$0xff] }
  0x69   :  { %791 = vmatpush3.bf16.msra.mxu0 %v790_v13  ;;  %v1183_v13 = vsub.s32 0, %v206_v11  ;;  %v467_v28 = vld [vmem:[#allocation10 + $0x38] sm:$0xff]  ;;  %v469_v31 = vld [vmem:[#allocation10 + $0x48] sm:$0xff] }
  0x6a   :  { %792 = vmatprep.subr.bf16.mxu0 %v1040_v0  ;;  %812 = vmatpush3.bf16.msra.mxu1 %v811_v35  ;;  %v346_v35 = vld [vmem:[#allocation8 + $0x40] sm:$0xff] }
  0x6b   :  { %813 = vmatprep.subr.bf16.mxu1 %v1040_v0  ;;  %v841_v37 = vpack.c.bf16 %v347_v36, %v346_v35  ;;  %v472_v35 = vld [vmem:[#allocation10 + $0x60] sm:$0xff]  ;;  %v473_v36 = vld [vmem:[#allocation10 + $0x68] sm:$0xff] }
  0x6d   :  { %794 = vmatpush3.bf16.msra.mxu0 %v793_v16  ;;  %v181_v16 = vld [vmem:[%s1242_s5 + $0x1] sm:$0x1] }
  0x6e   :  { %795 = vmatprep.subr.bf16.mxu0 %v1040_v0  ;;  %815 = vmatpush3.bf16.msra.mxu1 %v814_v38  ;;  %v348_v38 = vld [vmem:[#allocation8 + $0x50] sm:$0xff] }
  0x6f   :  { %816 = vmatprep.subr.bf16.mxu1 %v1040_v0  ;;  %v844_v40 = vpack.c.bf16 %v349_v39, %v348_v38  ;;  %v474_v38 = vld [vmem:[#allocation10 + $0x70] sm:$0xff]  ;;  %v475_v39 = vld [vmem:[#allocation10 + $0x78] sm:$0xff] }
  0x71   :  { %797 = vmatpush3.bf16.msra.mxu0 %v796_v19 }
  0x72   :  { %798 = vmatprep.subr.bf16.mxu0 %v1040_v0  ;;  %818 = vmatpush3.bf16.msra.mxu1 %v817_v41  ;;  %v350_v41 = vld [vmem:[#allocation8 + $0x60] sm:$0xff] }
  0x73   :  { %819 = vmatprep.subr.bf16.mxu1 %v1040_v0  ;;  %v847_v43 = vpack.c.bf16 %v351_v42, %v350_v41 }
  0x75   :  { %800 = vmatpush3.bf16.msra.mxu0 %v799_v22 }
  0x76   :  { %801 = vmatprep.subr.bf16.mxu0 %v1040_v0  ;;  %821 = vmatpush3.bf16.msra.mxu1 %v820_v44  ;;  %v352_v44 = vld [vmem:[#allocation8 + $0x70] sm:$0xff] }
  0x77   :  { %822 = vmatprep.subr.bf16.mxu1 %v1040_v0  ;;  %v850_v46 = vpack.c.bf16 %v353_v45, %v352_v44 }
  0x79   :  { %803 = vmatpush3.bf16.msra.mxu0 %v802_v25  ;;  %v339_v25 = vld [vmem:[#allocation8 + $0x8] sm:$0xff] }
  0x7a   :  { %828 = vmatprep.subr.bf16.mxu0 %v1040_v0  ;;  %824 = vmatpush3.bf16.msra.mxu1 %v823_v47 }
  0x7b   :  { %825 = vmatprep.subr.bf16.mxu1 %v1040_v0 }
  0x7c   :  { %673 = vmatmul.mubr.f32.vlgmr.msra.gmra.mrb[0].mxu0 %v93_v26  ;;  %v829_v26 = vpack.c.bf16 %v339_v25, %v338_v24  ;;  %v464_v24 = vld [vmem:[#allocation10 + $0x20] sm:$0xff]  ;;  %v465_v25 = vld [vmem:[#allocation10 + $0x28] sm:$0xff] }
  0x7d   :  { %742 = vmatprep.mubr.msk.f32.mxu0 %vm1041_vm0, %v1042_v1 }
  0x7e   :  { %827 = vmatpush3.bf16.msra.mxu1 %v826_v50  ;;  %830 = vmatpush3.bf16.msra.mxu0 %v829_v26  ;;  %v859_v26 = vpack.c.bf16 %v465_v25, %v464_v24 }
  0x7f   :  { %852 = vmatprep.subr.bf16.mxu1 %v1040_v0  ;;  %831 = vmatprep.subr.bf16.mxu0 %v1040_v0 }
  0x82   :  { %833 = vmatpush3.bf16.msra.mxu0 %v832_v29  ;;  %v862_v29 = vpack.c.bf16 %v467_v28, %v466_v27 }
  0x83   :  { %834 = vmatprep.subr.bf16.mxu0 %v1040_v0 }
  0x86   :  { %836 = vmatpush3.bf16.msra.mxu0 %v835_v32  ;;  %v865_v32 = vpack.c.bf16 %v469_v31, %v468_v30 }
  0x87   :  { %837 = vmatprep.subr.bf16.mxu0 %v1040_v0 }
 0x14f   :  { %v176_v51 = vpop.f32.mrb[0].mxu0 }
 0x150   :  { %v182_v52 = vrot.slane %v176_v51, 4  ;;  %v188_v53 = vmul.f32 %v176_v51, %v176_v51  ;;  %v674_v54 = vpop.f32.mrb[1].mxu0 }
 0x152   :  { %v183_v55 = vadd.f32 %v182_v52, %v176_v51  ;;  %v189_v56 = vrot.slane %v188_v53, 4 }
 0x154   :  { %v184_v57 = vrot.slane %v183_v55, 2  ;;  %v190_v58 = vadd.f32 %v189_v56, %v188_v53 }
 0x156   :  { %v185_v59 = vadd.f32 %v184_v57, %v183_v55  ;;  %v191_v60 = vrot.slane %v190_v58, 2 }
 0x158   :  { %v186_v61 = vrot.slane %v185_v59, 1  ;;  %v192_v62 = vadd.f32 %v191_v60, %v190_v58 }
 0x15a   :  { %v187_v63 = vadd.f32 %v186_v61, %v185_v59  ;;  %v193_v2 = vrot.slane %v192_v62, 1 }
 0x15c   :  { %v194_v3 = vadd.f32 %v193_v2, %v192_v62  ;;  %v195_v4 = vmul.f32 0.125, %v187_v63 }
 0x15e   :  { %v196_v5 = vmul.f32 0.125, %v194_v3  ;;  %v197_v6 = vmul.f32 %v195_v4, %v195_v4 }
 0x160   :  { %v198_v7 = vsub.f32 %v196_v5, %v197_v6  ;;  %v302_v6 = vld [vmem:[%s1242_s5 + $0x2] sm:$0x1] }
 0x162   :  { %v199_v8 = vmax.f32 %v198_v7, 0.0 }
 0x164   :  { %v200_v9 = vadd.f32 1e-05, %v199_v8 }
 0x166   :  { %887 = vrsqrt.f32 %v200_v9  ;;  %v303_v9 = vld [vmem:[%s1242_s5 + $0x3] sm:$0x1] }
 0x170   :  { %v888_v14 = vpop.eup %887 }
 0x171   :  { %v202_v15 = vmul.f32 %v888_v14, %v180_v12 }
 0x173   :  { %v208_v17 = vrot.slane %v202_v15, %v1183_v13  ;;  %v203_v18 = vmul.f32 %v202_v15, %v195_v4 }
 0x175   :  { %v204_v19 = vsub.f32 %v181_v16, %v203_v18  ;;  %v209_v20 = vmul.f32 %v208_v17, %v176_v51  ;;  %v460_v18 = vld [vmem:[#allocation10] sm:$0xff] }
 0x177   :  { %v213_v21 = vrot.slane %v204_v19, %v1183_v13  ;;  %v461_v19 = vld [vmem:[#allocation10 + $0x8] sm:$0xff] }
 0x179   :  { %v214_v22 = vadd.f32 %v213_v21, %v209_v20  ;;  %v853_v20 = vpack.c.bf16 %v461_v19, %v460_v18  ;;  %v462_v21 = vld [vmem:[#allocation10 + $0x10] sm:$0xff] }
 0x17b   :  { %v215_v23 = vmax.f32 %v214_v22, 0.0  ;;  %v463_v22 = vld [vmem:[#allocation10 + $0x18] sm:$0xff] }
 0x17d   :  { %708 = vmatmul.mubr.f32.vlgmr.msra.gmra.mrb[0].mxu1 %v215_v23  ;;  %v856_v23 = vpack.c.bf16 %v463_v22, %v462_v21 }
 0x17e   :  { %777 = vmatprep.mubr.msk.f32.mxu1 %vm1041_vm0, %v1042_v1  ;;  %v345_v1 = vld [vmem:[#allocation8 + $0x38] sm:$0xff]  ;;  %854 = vmatpush3.bf16.msra.mxu1 %v853_v20 }
 0x17f   :  { %v838_v34 = vpack.c.bf16 %v345_v1, %v344_v33  ;;  %855 = vmatprep.subr.bf16.mxu1 %v1040_v0  ;;  %v470_v33 = vld [vmem:[#allocation10 + $0x50] sm:$0xff]  ;;  %v471_v1 = vld [vmem:[#allocation10 + $0x58] sm:$0xff] }
 0x181   :  { %839 = vmatpush3.bf16.msra.mxu0 %v838_v34  ;;  %v868_v34 = vpack.c.bf16 %v471_v1, %v470_v33 }
 0x182   :  { %840 = vmatprep.subr.bf16.mxu0 %v1040_v0  ;;  %857 = vmatpush3.bf16.msra.mxu1 %v856_v23 }
 0x183   :  { %858 = vmatprep.subr.bf16.mxu1 %v1040_v0 }
 0x185   :  { %842 = vmatpush3.bf16.msra.mxu0 %v841_v37  ;;  %v871_v37 = vpack.c.bf16 %v473_v36, %v472_v35 }
 0x186   :  { %843 = vmatprep.subr.bf16.mxu0 %v1040_v0  ;;  %860 = vmatpush3.bf16.msra.mxu1 %v859_v26 }
 0x187   :  { %861 = vmatprep.subr.bf16.mxu1 %v1040_v0 }
 0x189   :  { %845 = vmatpush3.bf16.msra.mxu0 %v844_v40  ;;  %v874_v40 = vpack.c.bf16 %v475_v39, %v474_v38 }
 0x18a   :  { %846 = vmatprep.subr.bf16.mxu0 %v1040_v0  ;;  %863 = vmatpush3.bf16.msra.mxu1 %v862_v29 }
 0x18b   :  { %864 = vmatprep.subr.bf16.mxu1 %v1040_v0 }
 0x18d   :  { %848 = vmatpush3.bf16.msra.mxu0 %v847_v43 }
 0x18e   :  { %849 = vmatprep.subr.bf16.mxu0 %v1040_v0  ;;  %866 = vmatpush3.bf16.msra.mxu1 %v865_v32 }
 0x18f   :  { %867 = vmatprep.subr.bf16.mxu1 %v1040_v0 }
 0x191   :  { %851 = vmatpush3.bf16.msra.mxu0 %v850_v46 }
 0x192   :  { %869 = vmatpush3.bf16.msra.mxu1 %v868_v34 }
 0x193   :  { %870 = vmatprep.subr.bf16.mxu1 %v1040_v0 }
 0x196   :  { %872 = vmatpush3.bf16.msra.mxu1 %v871_v37 }
 0x197   :  { %873 = vmatprep.subr.bf16.mxu1 %v1040_v0 }
 0x19a   :  { %875 = vmatpush3.bf16.msra.mxu1 %v874_v40 }
 0x250   :  { %v298_v47 = vpop.f32.mrb[0].mxu1 }
 0x251   :  { %v304_v48 = vrot.slane %v298_v47, 4  ;;  %v310_v49 = vmul.f32 %v298_v47, %v298_v47  ;;  %v709_v50 = vpop.f32.mrb[1].mxu1 }
 0x253   :  { %v305_v51 = vadd.f32 %v304_v48, %v298_v47  ;;  %v311_v52 = vrot.slane %v310_v49, 4 }
 0x255   :  { %v306_v53 = vrot.slane %v305_v51, 2  ;;  %v312_v54 = vadd.f32 %v311_v52, %v310_v49 }
 0x257   :  { %v307_v55 = vadd.f32 %v306_v53, %v305_v51  ;;  %v313_v56 = vrot.slane %v312_v54, 2 }
 0x259   :  { %v308_v57 = vrot.slane %v307_v55, 1  ;;  %v314_v58 = vadd.f32 %v313_v56, %v312_v54 }
 0x25b   :  { %v309_v59 = vadd.f32 %v308_v57, %v307_v55  ;;  %v315_v60 = vrot.slane %v314_v58, 1 }
 0x25d   :  { %v316_v61 = vadd.f32 %v315_v60, %v314_v58  ;;  %v317_v62 = vmul.f32 0.125, %v309_v59 }
 0x25f   :  { %v318_v63 = vmul.f32 0.125, %v316_v61  ;;  %v319_v2 = vmul.f32 %v317_v62, %v317_v62  ;;  %v424_v61 = vld [vmem:[%s1242_s5 + $0x4] sm:$0x1] }
 0x261   :  { %v320_v3 = vsub.f32 %v318_v63, %v319_v2  ;;  %v425_v2 = vld [vmem:[%s1242_s5 + $0x5] sm:$0x1]  ;;  %s1003_s5 = scalar_lea.vmem %s561_s0, 128 }
 0x262   :  { %p1004_p12 = scmp.ne.s32.totalorder %s561_s0, %s1003_s5  ;;  %p1009_p0 = scmp.lt.s32.totalorder %s1003_s5, %s1003_s5 }
 0x263   :  { %v321_v4 = vmax.f32 %v320_v3, 0.0 }
 0x264   :  { %p1010_p1 = por %p1009_p0, %p1008_p13 }
 0x265   :  { %v322_v5 = vadd.f32 1e-05, %v321_v4 }
 0x266   :  { %p1011_p2 = pnand %p1010_p1, %p1004_p12 }
 0x267   :  { %889 = vrsqrt.f32 %v322_v5 }
 0x271   :  { %v890_v7 = vpop.eup %889 }
 0x272   :  { %v324_v8 = vmul.f32 %v890_v7, %v302_v6 }
 0x274   :  { %v325_v10 = vmul.f32 %v324_v8, %v317_v62  ;;  %v330_v11 = vrot.slane %v324_v8, %v1183_v13 }
 0x276   :  { %v326_v12 = vsub.f32 %v303_v9, %v325_v10  ;;  %v331_v14 = vmul.f32 %v330_v11, %v298_v47  ;;  %v571_v10 = vld [vmem:[%s1243_s6] ss:$0 sm:$0xff] }
 0x278   :  { %v335_v15 = vrot.slane %v326_v12, %v1183_v13 }
 0x27a   :  { %v336_v16 = vadd.f32 %v335_v15, %v331_v14 }
 0x27c   :  { %v337_v17 = vmax.f32 %v336_v16, 0.0 }
 0x27e   :  { %743 = vmatmul.mubr.f32.vlgmr.msra.gmra.mrb[2].mxu0 %v337_v17 }
 0x351   :  { %v420_v41 = vpop.f32.mrb[2].mxu0 }
 0x352   :  { %v426_v42 = vrot.slane %v420_v41, 4  ;;  %v432_v43 = vmul.f32 %v420_v41, %v420_v41  ;;  %v744_v44 = vpop.f32.mrb[3].mxu0 }
 0x354   :  { %v427_v45 = vadd.f32 %v426_v42, %v420_v41  ;;  %v433_v46 = vrot.slane %v432_v43, 4 }
 0x356   :  { %v428_v47 = vrot.slane %v427_v45, 2  ;;  %v434_v48 = vadd.f32 %v433_v46, %v432_v43 }
 0x358   :  { %v429_v49 = vadd.f32 %v428_v47, %v427_v45  ;;  %v435_v50 = vrot.slane %v434_v48, 2 }
 0x35a   :  { %v430_v51 = vrot.slane %v429_v49, 1  ;;  %v436_v52 = vadd.f32 %v435_v50, %v434_v48 }
 0x35c   :  { %v431_v53 = vadd.f32 %v430_v51, %v429_v49  ;;  %v437_v54 = vrot.slane %v436_v52, 1 }
 0x35e   :  { %v438_v55 = vadd.f32 %v437_v54, %v436_v52  ;;  %v439_v0 = vmul.f32 0.125, %v431_v53 }
 0x360   :  { %v440_v56 = vmul.f32 0.125, %v438_v55  ;;  %v441_v57 = vmul.f32 %v439_v0, %v439_v0 }
 0x362   :  { %v442_v58 = vsub.f32 %v440_v56, %v441_v57 }
 0x364   :  { %v443_v59 = vmax.f32 %v442_v58, 0.0 }
 0x366   :  { %v444_v60 = vadd.f32 1e-05, %v443_v59 }
 0x368   :  { %891 = vrsqrt.f32 %v444_v60 }
 0x372   :  { %v892_v62 = vpop.eup %891 }
 0x373   :  { %v446_v63 = vmul.f32 %v892_v62, %v424_v61 }
 0x375   :  { %v447_v3 = vmul.f32 %v446_v63, %v439_v0  ;;  %v452_v4 = vrot.slane %v446_v63, %v1183_v13 }
 0x377   :  { %v448_v5 = vsub.f32 %v425_v2, %v447_v3  ;;  %v453_v6 = vmul.f32 %v452_v4, %v420_v41 }
 0x379   :  { %v457_v7 = vrot.slane %v448_v5, %v1183_v13 }
 0x37b   :  { %v458_v8 = vadd.f32 %v457_v7, %v453_v6 }
 0x37d   :  { %v459_v9 = vmax.f32 %v458_v8, 0.0 }
 0x37f   :  { %778 = vmatmul.mubr.f32.vlgmr.msra.gmra.mrb[2].mxu1 %v459_v9 }
 0x452   :  { %v549_v11 = vpop.f32.mrb[2].mxu1 }
 0x453   :  { %v550_v12 = vadd.f32 %v571_v10, %v549_v11  ;;  %v779_v14 = vpop.f32.mrb[3].mxu1 }
 0x455   :  { %553 = vst [vmem:[#allocation11] sm:$0xff] %v550_v12 }
 0x456   :  { %1014 = shalt.err (!%p1011_p2)
}
 0x457   :  { %s1015_s28 = scalar_lea.hbm %s1244_s7, 128 }
 0x458   :  { %p1016_p3 = scmp.ne.s32.totalorder %s1244_s7, %s1015_s28  ;;  %p1019_p4 = scmp.lt.u32.totalorder %s1015_s28, %s1244_s7 }
 0x45a   :  { %p1021_p5 = pnand %p1019_p4, %p1016_p3 }
 0x45c   :  { %1024 = shalt.err (!%p1021_p5)
}
 0x45d   :  { %563 = dma.vmem_to_hbm [thread:$0]  %s561_s0, 128, %s1244_s7, [#allocation4]  }
 0x45e   :  { %1031 = dma.done.wait [#allocation4], 128  }
 0x45f   :  { %1032 = vsyncadd [#allocation4], 4294967168 }
 0x460   :  { %567 = vsyncpa [#allocation3], 1 }
 0x461   :  { %568 = vsyncpa [#allocation6], 1 }
 0x462   :  { %569 = vsyncpa [#allocation9], 1 }
 0x463   :  { %570 = vsyncpa [#allocation4], 1 }

</bundles_post_ra>
